<compile_context>
chip_gen: v5e
topology: v5e:2x2
jax: 0.10.0
libtpu: 0.0.40
codegen_flags: <defaults>
</compile_context>

<pallas_src>
import functools

import jax
import jax.numpy as jnp
from jax import lax
from jax.experimental import pallas as pl
from jax.experimental.pallas import tpu as pltpu

GN_EPS = 1e-5
NUM_GROUPS = 32
MXU_DTYPE = jnp.bfloat16      # MXU operand dtype (f32 accumulation)
ACT_DTYPE = jnp.bfloat16      # dtype of the streamed intermediate activation h
ACT_DTYPE_BYTES = 2


# --------------------------------------------------------------------------
# Generation-aware VMEM limit / tile-sizing budget.
# --------------------------------------------------------------------------
@functools.lru_cache(maxsize=None)
def _vmem_params():
    cap = 64 * 1024 * 1024
    try:
        info = pltpu.get_tpu_info()
        cap = int(getattr(info, "vmem_capacity_bytes", cap))
    except Exception:
        pass
    # v5e/v6e (128 MiB physical): ~96 MiB limit / ~57 MiB budget.
    # v7x     (64 MiB physical):  ~48 MiB limit / ~28 MiB budget.
    limit = min(cap * 3 // 4, 100 * 1024 * 1024)
    budget = limit * 3 // 5
    return limit, budget


def _pick_stats_tile_h(H, W, C, budget):
    """Largest row tile (divisor of H) for the HBM-streaming stats kernel."""
    best = 1
    for th in range(1, H + 1):
        if H % th:
            continue
        if 2 * 4 * th * W * C + 4096 <= budget:   # double-buffered f32 tile
            best = th
    return best


def _pick_conv_tile_h(H, W, cin, cout, cres, in_bytes, out_bytes, budget):
    """Largest row tile (divisor of H) fitting the fused GN+SiLU+conv kernel."""
    best = 1
    tap_k = 9 * cin if cin < 128 else cin
    for th in range(1, H + 1):
        if H % th:
            continue
        stream = 2 * ((th + 2) * W * cin * in_bytes       # x tile + halo rows
                      + th * W * cout * out_bytes         # output block
                      + th * W * cres * 4)                # residual stream (f32)
        weights = 2 * (2 * (9 * cin * cout + cres * cout)     # bf16, dbl-buffered
                       + 4 * (4 * cout + 2 * cin))             # f32 bias/scale/shift
        scratch = ((th + 2) * (W + 2) * cin * 2           # padded activation bf16
                   + th * W * tap_k * 2                   # patch / shifted slabs
                   + th * W * cout * (4 + out_bytes))     # f32 acc + cast copy
        if stream + weights + scratch <= budget:
            best = th
    return best


# --------------------------------------------------------------------------
# Shared GroupNorm finalize: per-channel sums -> per-channel scale/shift.
#   scale_c = gamma_c * rsqrt(var_g + eps)
#   shift_c = beta_c - mean_g * scale_c
# --------------------------------------------------------------------------
def _finalize_scale_shift(sum_c, sq_c, gamma, beta, *, groups, hw_total):
    C = sum_c.shape[-1]
    cpg = C // groups
    n = float(hw_total * cpg)
    s_g = jnp.sum(sum_c.reshape(groups, cpg), axis=1, keepdims=True)
    q_g = jnp.sum(sq_c.reshape(groups, cpg), axis=1, keepdims=True)
    mean_g = s_g / n
    # Single-pass E[x^2]-E[x]^2 in f32; clamp guards tiny negative variance.
    # TODO(synk): use a shifted / two-pass reduction if |mean| >> std inputs
    # ever need tighter parity with PyTorch GroupNorm.
    var_g = jnp.maximum(q_g / n - mean_g * mean_g, 0.0)
    inv_g = lax.rsqrt(var_g + GN_EPS)
    mean_c = jnp.broadcast_to(mean_g, (groups, cpg)).reshape(1, C)
    inv_c = jnp.broadcast_to(inv_g, (groups, cpg)).reshape(1, C)
    g = gamma.astype(jnp.float32).reshape(1, C)
    b = beta.astype(jnp.float32).reshape(1, C)
    scale_c = g * inv_c
    shift_c = b - mean_c * scale_c
    return scale_c, shift_c


# --------------------------------------------------------------------------
# Kernel 1: GroupNorm statistics for GN1 (only pass over raw x).
# Row-tiled accumulation (grid=(B, H//tile_h)), finalized on the last tile.
# --------------------------------------------------------------------------
def _gn_stats_kernel(x_ref, gamma_ref, beta_ref, scale_ref, shift_ref,
                     sum_sc, sq_sc, *, groups, hw_total):
    t = pl.program_id(1)

    @pl.when(t == 0)
    def _():
        sum_sc[...] = jnp.zeros_like(sum_sc)
        sq_sc[...] = jnp.zeros_like(sq_sc)

    _, TH, W, C = x_ref.shape
    xf = x_ref[0].astype(jnp.float32).reshape(TH * W, C)
    sum_sc[...] += jnp.sum(xf, axis=0, keepdims=True)
    sq_sc[...] += jnp.sum(xf * xf, axis=0, keepdims=True)

    @pl.when(t == pl.num_programs(1) - 1)
    def _():
        sc, sh = _finalize_scale_shift(sum_sc[...], sq_sc[...],
                                       gamma_ref[...], beta_ref[...],
                                       groups=groups, hw_total=hw_total)
        scale_ref[...] = sc.reshape(1, 1, C)
        shift_ref[...] = sh.reshape(1, 1, C)


def gn_scale_shift(x, gamma, beta, *, tile_h, vmem_limit, groups=NUM_GROUPS):
    B, H, W, C = x.shape
    assert H % tile_h == 0, (H, tile_h)
    nt = H // tile_h
    kernel = functools.partial(_gn_stats_kernel, groups=groups, hw_total=H * W)
    return pl.pallas_call(
        kernel,
        out_shape=(jax.ShapeDtypeStruct((B, 1, C), jnp.float32),
                   jax.ShapeDtypeStruct((B, 1, C), jnp.float32)),
        grid_spec=pltpu.PrefetchScalarGridSpec(
            num_scalar_prefetch=0,
            grid=(B, nt),
            in_specs=[
                pl.BlockSpec((1, tile_h, W, C), lambda b, t: (b, t, 0, 0)),
                pl.BlockSpec((1, C), lambda b, t: (0, 0)),
                pl.BlockSpec((1, C), lambda b, t: (0, 0)),
            ],
            out_specs=[
                pl.BlockSpec((1, 1, C), lambda b, t: (b, 0, 0)),
                pl.BlockSpec((1, 1, C), lambda b, t: (b, 0, 0)),
            ],
            scratch_shapes=[pltpu.VMEM((1, C), jnp.float32),
                            pltpu.VMEM((1, C), jnp.float32)],
        ),
        compiler_params=pltpu.CompilerParams(
            dimension_semantics=("parallel", "arbitrary"),
            vmem_limit_bytes=vmem_limit),
    )(x, gamma.reshape(1, C), beta.reshape(1, C))


# --------------------------------------------------------------------------
# Kernel 2: fused GN-apply + SiLU + 3x3 conv (+ bias) (+ residual add or fused
# 1x1 projection) (+ optional GN2 stats emitted from the in-VMEM result).
# Row-tiled with 1-row halos fetched via clamped index_maps; SAME padding
# (in activation space) built in bf16 VMEM values.
# --------------------------------------------------------------------------
def _fused_gn_silu_conv3x3_kernel(*refs, res_mode, tap_mode, emit_stats,
                                  lane_dense, groups, hw_total):
    it = iter(refs)
    scale_ref = next(it)
    shift_ref = next(it)
    xt_ref = next(it)
    xm_ref = next(it)
    xb_ref = next(it)
    w_ref = next(it)
    b_ref = next(it)
    res_ref = rw_ref = rb_ref = None
    if res_mode != "none":
        res_ref = next(it)
    if res_mode == "proj":
        rw_ref = next(it)
        rb_ref = next(it)
    if emit_stats:
        gamma2_ref = next(it)
        beta2_ref = next(it)
    o_ref = next(it)
    if emit_stats:
        scale2_ref = next(it)
        shift2_ref = next(it)
        sum_sc = next(it)
        sq_sc = next(it)

    t = pl.program_id(1)
    nt = pl.num_programs(1)
    _, TH, W, Cin = xm_ref.shape
    Cout = b_ref.shape[-1]

    scale = scale_ref[...].astype(jnp.float32).reshape(1, 1, Cin)
    shift = shift_ref[...].astype(jnp.float32).reshape(1, 1, Cin)

    def act(rows, mask=None):
        # GN affine + SiLU in f32, cast straight to bf16 (MXU operand dtype).
        y = rows.astype(jnp.float32) * scale + shift
        y = y * jax.nn.sigmoid(y)
        if mask is not None:
            y = y * mask
        return y.astype(MXU_DTYPE)

    # Halo rows are zero *activations* at the image border (the reference pads
    # the conv input, i.e. the post-GN+SiLU tensor, with zeros).
    top = act(xt_ref[0], jnp.where(t == 0, 0.0, 1.0))
    bot = act(xb_ref[0], jnp.where(t == nt - 1, 0.0, 1.0))
    mid = act(xm_ref[0])

    a = jnp.concatenate([top, mid, bot], axis=0)                  # (TH+2, W, Cin)
    zcol = jnp.zeros((TH + 2, 1, Cin), MXU_DTYPE)
    a = jnp.concatenate([zcol, a, zcol], axis=1)                  # (TH+2, W+2, Cin)

    if tap_mode == "fold9":
        # Small Cin: fold all 9 taps into a single K = 9*Cin MXU dot.
        patch = jnp.concatenate(
            [a[kh:kh + TH, kw:kw + W, :] for kh in range(3) for kw in range(3)],
            axis=-1).reshape(TH * W, 9 * Cin)
        acc = jnp.dot(patch, w_ref[...], preferred_element_type=jnp.float32)
    else:
        # Large Cin: 9 per-tap dots from W/H-shifted views (no lane concat).
        acc = jnp.zeros((TH * W, Cout), jnp.float32)
        for k in range(9):
            kh, kw = divmod(k, 3)
            slab = a[kh:kh + TH, kw:kw + W, :].reshape(TH * W, Cin)
            acc += jnp.dot(slab, w_ref[k], preferred_element_type=jnp.float32)

    acc += b_ref[...].astype(jnp.float32)                         # (1, Cout) bcast

    if res_mode == "identity":
        acc += res_ref[0].astype(jnp.float32).reshape(TH * W, Cout)
    elif res_mode == "proj":
        Cres = res_ref.shape[-1]
        xr = res_ref[0].astype(MXU_DTYPE).reshape(TH * W, Cres)
        acc += jnp.dot(xr, rw_ref[...], preferred_element_type=jnp.float32)
        acc += rb_ref[...].astype(jnp.float32)

    h_out = acc.astype(o_ref.dtype)                               # (TH*W, Cout)
    if lane_dense:
        o_ref[0] = h_out.reshape(TH, W * Cout)
    else:
        o_ref[0] = h_out.reshape(TH, W, Cout)

    if emit_stats:
        # GN2 statistics computed on the exact (rounded) values written to HBM,
        # while they are still in VMEM -> no extra HBM read of h later.
        hf = h_out.astype(jnp.float32)

        @pl.when(t == 0)
        def _():
            sum_sc[...] = jnp.zeros_like(sum_sc)
            sq_sc[...] = jnp.zeros_like(sq_sc)

        sum_sc[...] += jnp.sum(hf, axis=0, keepdims=True)
        sq_sc[...] += jnp.sum(hf * hf, axis=0, keepdims=True)

        @pl.when(t == nt - 1)
        def _():
            sc, sh = _finalize_scale_shift(sum_sc[...], sq_sc[...],
                                           gamma2_ref[...], beta2_ref[...],
                                           groups=groups, hw_total=hw_total)
            scale2_ref[...] = sc.reshape(1, 1, Cout)
            shift2_ref[...] = sh.reshape(1, 1, Cout)


def fused_gn_silu_conv3x3(x, scale, shift, w, b, *, tile_h, out_dtype,
                          vmem_limit, residual=None, res_w=None, res_b=None,
                          gn2=None):
    B, H, W, Cin = x.shape
    Cout = w.shape[-1]
    assert H % tile_h == 0, (H, tile_h)
    nt = H // tile_h
    emit_stats = gn2 is not None
    lane_dense = (Cout % 128) != 0
    tap_mode = "fold9" if Cin < 128 else "per_tap"

    # Pre-cast weights to bf16 in the wrapper (halves weight DMA / VMEM).
    if tap_mode == "fold9":
        w_p = w.reshape(9 * Cin, Cout).astype(MXU_DTYPE)
        w_spec = pl.BlockSpec((9 * Cin, Cout), lambda bb, tt: (0, 0))
    else:
        w_p = w.reshape(9, Cin, Cout).astype(MXU_DTYPE)
        w_spec = pl.BlockSpec((9, Cin, Cout), lambda bb, tt: (0, 0, 0))
    b_p = b.reshape(1, Cout).astype(jnp.float32)

    if residual is None:
        res_mode = "none"
    elif res_w is None:
        res_mode = "identity"
    else:
        res_mode = "proj"

    def top_map(bb, tt):   # row above the tile, clamped (zeroed at t==0)
        return (bb, jnp.maximum(tt * tile_h - 1, 0), 0, 0)

    def bot_map(bb, tt):   # row below the tile, clamped (zeroed at last tile)
        return (bb, jnp.minimum((tt + 1) * tile_h, H - 1), 0, 0)

    # TODO(synk): grid-invariant blocks (scale/shift/weights/bias/res_w/res_b)
    # would benefit from pipeline_mode=pl.Buffered(1) to avoid double-buffering;
    # left off here until single-buffered pipeline_mode is verified on all
    # target generations.
    in_specs = [
        pl.BlockSpec((1, 1, Cin), lambda bb, tt: (bb, 0, 0)),               # scale
        pl.BlockSpec((1, 1, Cin), lambda bb, tt: (bb, 0, 0)),               # shift
        pl.BlockSpec((1, 1, W, Cin), top_map),                              # top halo
        pl.BlockSpec((1, tile_h, W, Cin), lambda bb, tt: (bb, tt, 0, 0)),   # x tile
        pl.BlockSpec((1, 1, W, Cin), bot_map),                              # bottom halo
        w_spec,                                                             # weights
        pl.BlockSpec((1, Cout), lambda bb, tt: (0, 0)),                     # bias
    ]
    args = [scale, shift, x, x, x, w_p, b_p]

    if res_mode != "none":
        Cres = residual.shape[-1]
        in_specs.append(pl.BlockSpec((1, tile_h, W, Cres),
                                     lambda bb, tt: (bb, tt, 0, 0)))
        args.append(residual)
    if res_mode == "proj":
        in_specs.append(pl.BlockSpec((Cres, Cout), lambda bb, tt: (0, 0)))
        in_specs.append(pl.BlockSpec((1, Cout), lambda bb, tt: (0, 0)))
        args.append(res_w.astype(MXU_DTYPE))
        args.append(res_b.reshape(1, Cout).astype(jnp.float32))
    if emit_stats:
        gamma2, beta2 = gn2
        in_specs.append(pl.BlockSpec((1, Cout), lambda bb, tt: (0, 0)))
        in_specs.append(pl.BlockSpec((1, Cout), lambda bb, tt: (0, 0)))
        args.append(gamma2.reshape(1, Cout).astype(jnp.float32))
        args.append(beta2.reshape(1, Cout).astype(jnp.float32))

    # Lane-dense output for Cout < 128: present (B, H, W*Cout) at the boundary.
    if lane_dense:
        o_shape = jax.ShapeDtypeStruct((B, H, W * Cout), out_dtype)
        o_spec = pl.BlockSpec((1, tile_h, W * Cout), lambda bb, tt: (bb, tt, 0))
    else:
        o_shape = jax.ShapeDtypeStruct((B, H, W, Cout), out_dtype)
        o_spec = pl.BlockSpec((1, tile_h, W, Cout), lambda bb, tt: (bb, tt, 0, 0))

    if emit_stats:
        out_shapes = (o_shape,
                      jax.ShapeDtypeStruct((B, 1, Cout), jnp.float32),
                      jax.ShapeDtypeStruct((B, 1, Cout), jnp.float32))
        out_specs = (o_spec,
                     pl.BlockSpec((1, 1, Cout), lambda bb, tt: (bb, 0, 0)),
                     pl.BlockSpec((1, 1, Cout), lambda bb, tt: (bb, 0, 0)))
        scratch = [pltpu.VMEM((1, Cout), jnp.float32),
                   pltpu.VMEM((1, Cout), jnp.float32)]
        dims = ("parallel", "arbitrary")   # row axis accumulates GN2 stats
    else:
        out_shapes = o_shape
        out_specs = o_spec
        scratch = []
        dims = ("parallel", "parallel")

    kernel = functools.partial(
        _fused_gn_silu_conv3x3_kernel, res_mode=res_mode, tap_mode=tap_mode,
        emit_stats=emit_stats, lane_dense=lane_dense,
        groups=NUM_GROUPS, hw_total=H * W)

    result = pl.pallas_call(
        kernel,
        out_shape=out_shapes,
        grid_spec=pltpu.PrefetchScalarGridSpec(
            num_scalar_prefetch=0,
            grid=(B, nt),
            in_specs=in_specs,
            out_specs=out_specs,
            scratch_shapes=scratch,
        ),
        compiler_params=pltpu.CompilerParams(
            dimension_semantics=dims,
            vmem_limit_bytes=vmem_limit),
    )(*args)

    if emit_stats:
        h, s2, t2 = result
        if lane_dense:
            h = h.reshape(B, H, W, Cout)    # free (contiguous) reshape
        return h, s2, t2
    out = result
    if lane_dense:
        out = out.reshape(B, H, W, Cout)
    return out


# --------------------------------------------------------------------------
# ResidualBlock forward.
# --------------------------------------------------------------------------
def residual_block_forward_nhwc(x, params, *, tile_h=None):
    B, H, W, Cin = x.shape
    Cout = params["conv1_w"].shape[-1]
    vmem_limit, budget = _vmem_params()

    # GN1 statistics: pure HBM streaming -> use its own (large) row tile.
    stats_th = _pick_stats_tile_h(H, W, Cin, budget)
    s1, t1 = gn_scale_shift(x, params["gn1_w"], params["gn1_b"],
                            tile_h=stats_th, vmem_limit=vmem_limit)

    # Stage 1: fused GN1+SiLU+conv1; emits h (bf16) AND GN2 scale/shift
    # (no second stats pass over h).
    th1 = tile_h if tile_h is not None else _pick_conv_tile_h(
        H, W, Cin, Cout, 0, x.dtype.itemsize, ACT_DTYPE_BYTES, budget)
    h, s2, t2 = fused_gn_silu_conv3x3(
        x, s1, t1, params["conv1_w"], params["conv1_b"],
        tile_h=th1, out_dtype=ACT_DTYPE, vmem_limit=vmem_limit,
        gn2=(params["gn2_w"], params["gn2_b"]))

    # Stage 2: fused GN2+SiLU+conv2 + residual (identity or fused 1x1 proj).
    th2 = tile_h if tile_h is not None else _pick_conv_tile_h(
        H, W, Cout, Cout, Cin, ACT_DTYPE_BYTES, x.dtype.itemsize, budget)
    if "res_w" in params:
        out = fused_gn_silu_conv3x3(
            h, s2, t2, params["conv2_w"], params["conv2_b"],
            tile_h=th2, out_dtype=x.dtype, vmem_limit=vmem_limit,
            residual=x, res_w=params["res_w"], res_b=params["res_b"])
    else:
        out = fused_gn_silu_conv3x3(
            h, s2, t2, params["conv2_w"], params["conv2_b"],
            tile_h=th2, out_dtype=x.dtype, vmem_limit=vmem_limit,
            residual=x)
    return out


def residual_block_forward(x_nchw, params, *, tile_h=None):
    # TODO(synk): in a full VAE keep activations NHWC end-to-end and drop these
    # per-block transposes (each one is an extra HBM round trip done by XLA).
    x = jnp.transpose(x_nchw, (0, 2, 3, 1))        # NCHW -> NHWC
    out = residual_block_forward_nhwc(x, params, tile_h=tile_h)
    return jnp.transpose(out, (0, 3, 1, 2))        # NHWC -> NCHW


# --------------------------------------------------------------------------
# Pure-JAX reference (validation only, full f32).
# --------------------------------------------------------------------------
def _ref_group_norm(x, gamma, beta, groups=NUM_GROUPS, eps=GN_EPS):
    B, H, W, C = x.shape
    xg = x.reshape(B, H, W, groups, C // groups)
    mean = xg.mean(axis=(1, 2, 4), keepdims=True)
    var = xg.var(axis=(1, 2, 4), keepdims=True)
    xn = ((xg - mean) / jnp.sqrt(var + eps)).reshape(B, H, W, C)
    return xn * gamma + beta


def _ref_conv(x, w, b, padding):
    y = lax.conv_general_dilated(
        x, w, window_strides=(1, 1), padding=padding,
        dimension_numbers=("NHWC", "HWIO", "NHWC"))
    return y + b


def _ref_forward(x_nchw, params):
    x = jnp.transpose(x_nchw, (0, 2, 3, 1))
    h = _ref_group_norm(x, params["gn1_w"], params["gn1_b"])
    h = jax.nn.silu(h)
    h = _ref_conv(h, params["conv1_w"], params["conv1_b"], "SAME")
    h = _ref_group_norm(h, params["gn2_w"], params["gn2_b"])
    h = jax.nn.silu(h)
    h = _ref_conv(h, params["conv2_w"], params["conv2_b"], "SAME")
    if "res_w" in params:
        r = _ref_conv(x, params["res_w"][None, None], params["res_b"], "VALID")
    else:
        r = x
    return jnp.transpose(h + r, (0, 3, 1, 2))


def make_params(key, in_channels, out_channels):
    ks = jax.random.split(key, 8)
    p = {
        "gn1_w": 1.0 + 0.1 * jax.random.normal(ks[0], (in_channels,), jnp.float32),
        "gn1_b": 0.1 * jax.random.normal(ks[1], (in_channels,), jnp.float32),
        "gn2_w": 1.0 + 0.1 * jax.random.normal(ks[2], (out_channels,), jnp.float32),
        "gn2_b": 0.1 * jax.random.normal(ks[3], (out_channels,), jnp.float32),
        "conv1_w": 0.05 * jax.random.normal(ks[4], (3, 3, in_channels, out_channels), jnp.float32),
        "conv1_b": 0.05 * jax.random.normal(ks[5], (out_channels,), jnp.float32),
        "conv2_w": 0.05 * jax.random.normal(ks[6], (3, 3, out_channels, out_channels), jnp.float32),
        "conv2_b": 0.05 * jax.random.normal(ks[7], (out_channels,), jnp.float32),
    }
    if in_channels != out_channels:
        kr1, kr2 = jax.random.split(jax.random.fold_in(key, 99))
        p["res_w"] = 0.05 * jax.random.normal(kr1, (in_channels, out_channels), jnp.float32)
        p["res_b"] = 0.05 * jax.random.normal(kr2, (out_channels,), jnp.float32)
    return p


if __name__ == "__main__":
    key = jax.random.PRNGKey(0)

    # GroupNorm(32, C) requires channels divisible by 32.
    configs = [
        # (B, Cin, Cout, H, W, tile_h)
        (2, 32, 64, 16, 16, None),    # 1x1-proj residual, fold9 taps, lane-dense out
        (2, 32, 64, 16, 16, 4),       # force 4 row tiles (halo + GN2-stat accumulation)
        (2, 32, 32, 16, 16, 8),       # identity residual, 2 row tiles
        (2, 128, 128, 16, 16, None),  # identity residual, per-tap MXU path, Cout%128==0
    ]
    for i, (B, Cin, Cout, H, W, th) in enumerate(configs):
        kx, kp = jax.random.split(jax.random.fold_in(key, i))
        x = jax.random.normal(kx, (B, Cin, H, W), jnp.float32)   # NCHW, like PyTorch
        params = make_params(kp, Cin, Cout)

        out = jax.block_until_ready(residual_block_forward(x, params, tile_h=th))
        ref = jax.block_until_ready(_ref_forward(x, params))

        assert out.shape == (B, Cout, H, W), out.shape
        # bf16 MXU operands + bf16-streamed intermediate activation (f32 accumulation)
        # -> compare with a relative-RMS check against the full-f32 reference.
        rel = float(jnp.linalg.norm(out - ref) / jnp.linalg.norm(ref))
        max_abs = float(jnp.max(jnp.abs(out - ref)))
        assert rel < 2e-2, (i, rel)
        assert max_abs < 0.25, (i, max_abs)

    print("KERNEL_OK")
</pallas_src>

<mosaic_0001>
module attributes {stable_mosaic.version = 11 : i64} {
  func.func @_gn_stats_kernel(%arg0: i32, %arg1: i32, %arg2: memref<1x16x16x32xf32, #tpu.memory_space<vmem>>, %arg3: memref<1x32xf32, #tpu.memory_space<vmem>>, %arg4: memref<1x32xf32, #tpu.memory_space<vmem>>, %arg5: memref<1x1x32xf32, #tpu.memory_space<vmem>>, %arg6: memref<1x1x32xf32, #tpu.memory_space<vmem>>, %arg7: memref<1x32xf32, #tpu.memory_space<vmem>>, %arg8: memref<1x32xf32, #tpu.memory_space<vmem>>) attributes {dimension_semantics = [#tpu.dimension_semantics<parallel>, #tpu.dimension_semantics<arbitrary>], iteration_bounds = array<i64: 2, 1>, scalar_prefetch = 0 : i64, scratch_operands = 2 : i64, tpu.core_type = #tpu.core_type<tc>, window_params = [{transform_indices = @transform_0, window_bounds = array<i64: 1, 16, 16, 32>}, {pipeline_mode = #tpu.pipeline_mode<synchronous>, transform_indices = @transform_1, window_bounds = array<i64: 1, 32>}, {pipeline_mode = #tpu.pipeline_mode<synchronous>, transform_indices = @transform_2, window_bounds = array<i64: 1, 32>}, {transform_indices = @transform_3, window_bounds = array<i64: 1, 1, 32>}, {transform_indices = @transform_4, window_bounds = array<i64: 1, 1, 32>}]} {
    %c0_i32 = arith.constant 0 : i32
    %0 = arith.cmpi eq, %arg1, %c0_i32 : i32
    %1 = arith.extui %0 : i1 to i32
    %c0_i32_0 = arith.constant 0 : i32
    %2 = arith.cmpi ne, %1, %c0_i32_0 : i32
    scf.if %2 {
      %cst_15 = arith.constant 0.000000e+00 : f32
      %20 = vector.broadcast %cst_15 : f32 to vector<1x32xf32>
      %c0_16 = arith.constant 0 : index
      %c0_17 = arith.constant 0 : index
      %21 = vector.load %arg7[%c0_16, %c0_17] : memref<1x32xf32, #tpu.memory_space<vmem>>, vector<1x32xf32>
      tpu.vector_store %arg7[%c0_16, %c0_17], %20 {strides = array<i32>} : memref<1x32xf32, #tpu.memory_space<vmem>>, vector<1x32xf32>,
      %cst_18 = arith.constant 0.000000e+00 : f32
      %22 = vector.broadcast %cst_18 : f32 to vector<1x32xf32>
      %c0_19 = arith.constant 0 : index
      %c0_20 = arith.constant 0 : index
      %23 = vector.load %arg8[%c0_19, %c0_20] : memref<1x32xf32, #tpu.memory_space<vmem>>, vector<1x32xf32>
      tpu.vector_store %arg8[%c0_19, %c0_20], %22 {strides = array<i32>} : memref<1x32xf32, #tpu.memory_space<vmem>>, vector<1x32xf32>,
    } else {
    }
    %c0 = arith.constant 0 : index
    %c0_1 = arith.constant 0 : index
    %c0_2 = arith.constant 0 : index
    %c0_3 = arith.constant 0 : index
    %3 = vector.load %arg2[%c0, %c0_1, %c0_2, %c0_3] : memref<1x16x16x32xf32, #tpu.memory_space<vmem>>, vector<1x16x16x32xf32>
    %4 = vector.shape_cast %3 : vector<1x16x16x32xf32> to vector<16x16x32xf32>
    %5 = vector.shape_cast %4 : vector<16x16x32xf32> to vector<256x32xf32>
    %c0_4 = arith.constant 0 : index
    %c0_5 = arith.constant 0 : index
    %6 = vector.load %arg7[%c0_4, %c0_5] : memref<1x32xf32, #tpu.memory_space<vmem>>, vector<1x32xf32>
    %cst = arith.constant dense<0.000000e+00> : vector<32xf32>
    %7 = vector.multi_reduction <add>, %5, %cst [0] : vector<256x32xf32> to vector<32xf32>
    %8 = vector.shape_cast %7 : vector<32xf32> to vector<1x32xf32>
    %9 = arith.addf %6, %8 : vector<1x32xf32>
    %c0_6 = arith.constant 0 : index
    %c0_7 = arith.constant 0 : index
    %10 = vector.load %arg7[%c0_6, %c0_7] : memref<1x32xf32, #tpu.memory_space<vmem>>, vector<1x32xf32>
    tpu.vector_store %arg7[%c0_6, %c0_7], %9 {strides = array<i32>} : memref<1x32xf32, #tpu.memory_space<vmem>>, vector<1x32xf32>,
    %c0_8 = arith.constant 0 : index
    %c0_9 = arith.constant 0 : index
    %11 = vector.load %arg8[%c0_8, %c0_9] : memref<1x32xf32, #tpu.memory_space<vmem>>, vector<1x32xf32>
    %12 = arith.mulf %5, %5 : vector<256x32xf32>
    %cst_10 = arith.constant dense<0.000000e+00> : vector<32xf32>
    %13 = vector.multi_reduction <add>, %12, %cst_10 [0] : vector<256x32xf32> to vector<32xf32>
    %14 = vector.shape_cast %13 : vector<32xf32> to vector<1x32xf32>
    %15 = arith.addf %11, %14 : vector<1x32xf32>
    %c0_11 = arith.constant 0 : index
    %c0_12 = arith.constant 0 : index
    %16 = vector.load %arg8[%c0_11, %c0_12] : memref<1x32xf32, #tpu.memory_space<vmem>>, vector<1x32xf32>
    tpu.vector_store %arg8[%c0_11, %c0_12], %15 {strides = array<i32>} : memref<1x32xf32, #tpu.memory_space<vmem>>, vector<1x32xf32>,
    %c0_i32_13 = arith.constant 0 : i32
    %17 = arith.cmpi eq, %arg1, %c0_i32_13 : i32
    %18 = arith.extui %17 : i1 to i32
    %c0_i32_14 = arith.constant 0 : i32
    %19 = arith.cmpi ne, %18, %c0_i32_14 : i32
    scf.if %19 {
      %c0_15 = arith.constant 0 : index
      %c0_16 = arith.constant 0 : index
      %20 = vector.load %arg7[%c0_15, %c0_16] : memref<1x32xf32, #tpu.memory_space<vmem>>, vector<1x32xf32>
      %c0_17 = arith.constant 0 : index
      %c0_18 = arith.constant 0 : index
      %21 = vector.load %arg8[%c0_17, %c0_18] : memref<1x32xf32, #tpu.memory_space<vmem>>, vector<1x32xf32>
      %c0_19 = arith.constant 0 : index
      %c0_20 = arith.constant 0 : index
      %22 = vector.load %arg3[%c0_19, %c0_20] : memref<1x32xf32, #tpu.memory_space<vmem>>, vector<1x32xf32>
      %c0_21 = arith.constant 0 : index
      %c0_22 = arith.constant 0 : index
      %23 = vector.load %arg4[%c0_21, %c0_22] : memref<1x32xf32, #tpu.memory_space<vmem>>, vector<1x32xf32>
      %24 = vector.shape_cast %20 : vector<1x32xf32> to vector<32x1xf32>
      %cst_23 = arith.constant dense<0.000000e+00> : vector<32xf32>
      %25 = vector.multi_reduction <add>, %24, %cst_23 [1] : vector<32x1xf32> to vector<32xf32>
      %26 = vector.shape_cast %25 : vector<32xf32> to vector<32x1xf32>
      %27 = vector.shape_cast %21 : vector<1x32xf32> to vector<32x1xf32>
      %cst_24 = arith.constant dense<0.000000e+00> : vector<32xf32>
      %28 = vector.multi_reduction <add>, %27, %cst_24 [1] : vector<32x1xf32> to vector<32xf32>
      %29 = vector.shape_cast %28 : vector<32xf32> to vector<32x1xf32>
      %cst_25 = arith.constant 2.560000e+02 : f32
      %30 = vector.broadcast %cst_25 : f32 to vector<32x1xf32>
      %31 = arith.divf %26, %30 : vector<32x1xf32>
      %cst_26 = arith.constant 2.560000e+02 : f32
      %32 = vector.broadcast %cst_26 : f32 to vector<32x1xf32>
      %33 = arith.divf %29, %32 : vector<32x1xf32>
      %34 = arith.mulf %31, %31 : vector<32x1xf32>
      %35 = arith.subf %33, %34 : vector<32x1xf32>
      %cst_27 = arith.constant 0.000000e+00 : f32
      %36 = vector.broadcast %cst_27 : f32 to vector<32x1xf32>
      %37 = arith.maximumf %35, %36 : vector<32x1xf32>
      %cst_28 = arith.constant 9.99999974E-6 : f32
      %38 = vector.broadcast %cst_28 : f32 to vector<32x1xf32>
      %39 = arith.addf %37, %38 : vector<32x1xf32>
      %40 = math.rsqrt %39 : vector<32x1xf32>
      %41 = vector.shape_cast %31 : vector<32x1xf32> to vector<1x32xf32>
      %42 = vector.shape_cast %40 : vector<32x1xf32> to vector<1x32xf32>
      %43 = arith.mulf %22, %42 : vector<1x32xf32>
      %44 = arith.mulf %41, %43 : vector<1x32xf32>
      %45 = arith.subf %23, %44 : vector<1x32xf32>
      %46 = vector.shape_cast %43 : vector<1x32xf32> to vector<1x1x32xf32>
      %c0_29 = arith.constant 0 : index
      %c0_30 = arith.constant 0 : index
      %c0_31 = arith.constant 0 : index
      %47 = vector.load %arg5[%c0_29, %c0_30, %c0_31] : memref<1x1x32xf32, #tpu.memory_space<vmem>>, vector<1x1x32xf32>
      tpu.vector_store %arg5[%c0_29, %c0_30, %c0_31], %46 {strides = array<i32>} : memref<1x1x32xf32, #tpu.memory_space<vmem>>, vector<1x1x32xf32>,
      %48 = vector.shape_cast %45 : vector<1x32xf32> to vector<1x1x32xf32>
      %c0_32 = arith.constant 0 : index
      %c0_33 = arith.constant 0 : index
      %c0_34 = arith.constant 0 : index
      %49 = vector.load %arg6[%c0_32, %c0_33, %c0_34] : memref<1x1x32xf32, #tpu.memory_space<vmem>>, vector<1x1x32xf32>
      tpu.vector_store %arg6[%c0_32, %c0_33, %c0_34], %48 {strides = array<i32>} : memref<1x1x32xf32, #tpu.memory_space<vmem>>, vector<1x1x32xf32>,
    } else {
    }
    return
  }
  func.func @transform_0(%arg0: i32, %arg1: i32) -> (i32, i32, i32, i32) {
    %c0_i32 = arith.constant 0 : i32
    %c0_i32_0 = arith.constant 0 : i32
    %c0_i32_1 = arith.constant 0 : i32
    return %arg0, %arg1, %c0_i32, %c0_i32_0 : i32, i32, i32, i32
  }
  func.func @transform_1(%arg0: i32, %arg1: i32) -> (i32, i32) {
    %c0_i32 = arith.constant 0 : i32
    %c0_i32_0 = arith.constant 0 : i32
    %c0_i32_1 = arith.constant 0 : i32
    return %c0_i32, %c0_i32_0 : i32, i32
  }
  func.func @transform_2(%arg0: i32, %arg1: i32) -> (i32, i32) {
    %c0_i32 = arith.constant 0 : i32
    %c0_i32_0 = arith.constant 0 : i32
    %c0_i32_1 = arith.constant 0 : i32
    return %c0_i32, %c0_i32_0 : i32, i32
  }
  func.func @transform_3(%arg0: i32, %arg1: i32) -> (i32, i32, i32) {
    %c0_i32 = arith.constant 0 : i32
    %c0_i32_0 = arith.constant 0 : i32
    %c0_i32_1 = arith.constant 0 : i32
    return %arg0, %c0_i32, %c0_i32_0 : i32, i32, i32
  }
  func.func @transform_4(%arg0: i32, %arg1: i32) -> (i32, i32, i32) {
    %c0_i32 = arith.constant 0 : i32
    %c0_i32_0 = arith.constant 0 : i32
    %c0_i32_1 = arith.constant 0 : i32
    return %arg0, %c0_i32, %c0_i32_0 : i32, i32, i32
  }
}

</mosaic_0001>

<bundles_post_ra>
// kernel: tpu_custom_call.1
= control target key start
LH: loop header
LB: loop body
LE: loop exit
PB: predicated region body
PF: predicated region fallthrough
CT: control target
= control target key end

     0   :  { %s1682_s0 = inlined_call_operand.hbm [shape: f32[2,16,16,32], index: 0, kind: input, shape index: {}]   ;;  %s1683_s1 = inlined_call_operand.hbm [shape: f32[1,32], index: 1, kind: input, shape index: {}]   ;;  %s1684_s2 = inlined_call_operand.vmem [shape: f32[1,32], index: 2, kind: input, shape index: {}]   ;;  %s1685_s3 = inlined_call_operand.hbm [shape: f32[2,1,32], index: 3, kind: output, shape index: {0}]   ;;  %s1686_s4 = inlined_call_operand.hbm [shape: f32[2,1,32], index: 4, kind: output, shape index: {1}]  }
   0x1   :  { %1689 = sst [smem:[#allocation17_spill]] %s1683_s1 }
   0x2   :  { %10 = vsyncpa [#allocation5], 0 }
   0x3   :  { %12 = vsyncpa [#allocation5 + $0x1], 0 }
   0x4   :  { %13 = vsyncpa [#allocation8], 0 }
   0x5   :  { %14 = vsyncpa [#allocation6], 0 }
   0x6   :  { %16 = vsyncpa [#allocation6 + $0x1], 0 }
   0x7   :  { %17 = vsyncpa [#allocation11], 0 }
   0x8   :  { %19 = vsyncpa [#allocation11 + $0x1], 0  ;;  %s1326_s15 = smov 0   ;;  %s1328_s16 = smov 0  }
   0x9   :  { %s1330_s17 = smov 0   ;;  %s1332_s18 = smov 0  }
   0xa   :  { %s1334_s19 = smov 0   ;;  %s1336_s20 = smov 0  }
   0xb LB: > { %1690 = sst [smem:[#allocation16_spill]] %s1293_s20  ;;  %s992_s21 = sadd.s32 4294967295, %s1293_s20   ;;  %s1293_s20 = sphi %s1336_s20, %s25_s20   ;;  %s1289_s19 = sphi %s1334_s19, %s1704_s19   ;;  %s1285_s18 = sphi %s1332_s18, %s1703_s18   ;;  %s1281_s17 = sphi %s1330_s17, %s1702_s17   ;;  %s1277_s16 = sphi %s1328_s16, %s1701_s16   ;;  %s1273_s15 = sphi %s1326_s15, %s1700_s15  }
   0xc   : > { %s993_s22 = sadd.s32 4294967294, %s1293_s20   ;;  %s46_s23 = sadd.s32 1, %s1281_s17 }
   0xd   : > { %p53_p0 = scmp.ne.s32.totalorder %s1281_s17, %s1277_s16  ;;  %p54_p1 = scmp.eq.s32.totalorder %s1293_s20, 0 }
   0xe   : > { %p59_p2 = scmp.ne.s32.totalorder %s1277_s16, %s1273_s15  ;;  %p1364_p3 = scmp.eq.s32.totalorder %s992_s21, 0 }
   0xf   : > { %p125_p4 = scmp.eq.s32.totalorder %s992_s21, 1  ;;  %p1368_p5 = por %p54_p1, %p53_p0 }
  0x10   : > { %p131_p6 = scmp.eq.s32.totalorder %s993_s22, 1  ;;  %p1374_p7 = por %p1364_p3, %p59_p2 }
  0x11   : > { %p1378_p8 = por %p125_p4, %p53_p0  ;;  %p994_p10 = scmp.ge.s32.totalorder %s1293_s20, 1 }
  0x12   : > { %p1382_p9 = por %p131_p6, %p59_p2  ;;  %p164_p11 = scmp.lt.s32.totalorder %s1293_s20, 3 }
  0x13   : > { %s1696_s1 = sld [smem:[#allocation17_spill]]  ;;  %s1295_s7 = smov [#allocation7]  }
  0x14   : > { %p1391_p12 = pnand %p994_p10, %p164_p11  ;;  %s178_s8 = sshll.u32 %s1295_s7, 4  ;;  %s179_s8 = int_to_ptr.vmem [resolvable:$true] %s178_s8 }
  0x15   : > { %p996_p13 = scmp.ge.s32.totalorder %s1293_s20, 2  ;;  %p1032_p1 = scmp.lt.s32.totalorder %s1293_s20, 2 }
  0x16   : > { %p1016_p0 = pneg %p1391_p12  ;;  %s37_s10 = sadd.s32 1, %s1289_s19 }
  0x17   : > { %p1403_p4 = pnand %p1032_p1, %p1368_p5  ;;  %p39_p6 = scmp.ge.s32.totalorder %s37_s10, 2 }
  0x18   : > { %p1017_p2 = pnand %p1016_p0, %p1364_p3  ;;  %s192_s11 = sand.u32 1, %s1281_s17  }
  0x19   : > { %s176_s5 = sshll.u32 %s1696_s1, 4  ;;  %s1706_s10 = smov (%p39_p6, %s37_s10), 0  ;;  %s177_s5 = int_to_ptr.hbm [resolvable:$true] %s176_s5 }
  0x1a   : > { %1019 = dma.hbm_to_vmem [thread:$0]  (!%p1017_p2), %s177_s5, 16, %s179_s8, [#allocation8]  }
  0x1b   : > { %s997_s12 = sshll.u32 %s192_s11, 8  ;;  %s41_s13 = ssub.s32 %s1289_s19, %s1706_s10 }
  0x1c   : > { %p44_p10 = scmp.eq.s32.totalorder %s41_s13, 0  ;;  %s1005_s14 = sshll.u32 %s1289_s19, 8 }
  0x1d   : > { %s204_s25 = scalar_lea.hbm %s1682_s0, %s1005_s14  ;;  %s196_s29 = scalar_lea.vmem [#allocation4], %s997_s12 }
  0x1e   : > { %s207_s30 = sshll.u32 %s196_s29, 4  ;;  %s205_s1 = sshll.u32 %s204_s25, 4  ;;  %s208_s30 = int_to_ptr.vmem [resolvable:$true] %s207_s30  ;;  %s206_s1 = int_to_ptr.hbm [resolvable:$true] %s205_s1 }
  0x1f   : > { %s1420_s7 = scalar_select %p44_p10, %s1281_s17, %s46_s23  }
  0x20   : > { %s193_s5 = scalar_lea.sflag [#allocation5], %s192_s11  ;;  %s1296_s8 = smov 128  }
  0x21   : > { %s1297_s20 = smov 8   ;;  %219 = sbr.rel (%p1391_p12) target bundleno = 762 (0x2fa), region = 32 }
  0x22   : > { %1023 = dma.hbm_to_vmem [thread:$0]  (!%p1403_p4), %s206_s1, 4096, %s208_s30, %s193_s5, %s1296_s8, %s1296_s8, %s1297_s20  }
  0x23   : > { %s1427_s13 = sand.u32 (!%p1391_p12), 1, %s1277_s16  }
  0x24   : > { %s1001_s12 = sshll.u32 (!%p1391_p12), %s1427_s13, 8  ;;  %s222_s23 = scalar_lea.sflag (!%p1391_p12), [#allocation5], %s1427_s13 }
  0x25   : > { %s1431_s14 = scalar_lea.vmem (!%p1391_p12), [#allocation4], %s1001_s12 }
  0x26   : > { %1256 = dma.done.wait (%p1374_p7), %s222_s23, 4096  }
  0x27   : > { %1258 = vsyncadd (%p1374_p7), %s222_s23, 4294963200 }
  0x28   : > { %1260 = dma.done.wait (%p1364_p3), [#allocation8], 16  }
  0x29   : > { %1262 = vsyncadd (%p1364_p3), [#allocation8], 4294967280  ;;  %v486_v0 = vlaneseq  ;;  %vm264_vm0 = vcmask 253952   ;;  %v1298_v1 = vmov 0.0   ;;  %vm300_vm1 = vcmask 261120   ;;  %v267_v4 = vld [vmem:[%s1431_s14] sm:$0xff]  ;;  %s860_s26 = scalar_lea.hbm %s1685_s3, %s1285_s18 }
  0x2a   : > { %265 = vst.msk [vmem:[#allocation2] sm:$0x1] %vm264_vm0, %v1298_v1  ;;  %v268_v5 = vld [vmem:[%s1431_s14 + $0x8] sm:$0xff]  ;;  %v269_v6 = vld [vmem:[%s1431_s14 + $0x10] sm:$0xff]  ;;  %v270_v7 = vld [vmem:[%s1431_s14 + $0x18] sm:$0xff]  ;;  %v301_v8 = vsel %vm300_vm1, %v267_v4, 0.0  ;;  %v374_v23 = vmul.f32 %v267_v4, %v267_v4 }
  0x2b   : > { %v1443_v2 = vshrl.u32 %v486_v0, 7  ;;  %266 = vst.msk [vmem:[#allocation3] sm:$0x1] %vm264_vm0, %v1298_v1  ;;  %v302_v9 = vsel %vm300_vm1, %v268_v5, 0.0  ;;  %v304_v10 = vsel %vm300_vm1, %v269_v6, 0.0  ;;  %v271_v11 = vld [vmem:[%s1431_s14 + $0x20] sm:$0xff]  ;;  %v375_v26 = vmul.f32 %v268_v5, %v268_v5 }
  0x2c   : > { %v303_v12 = vadd.f32 %v302_v9, %v301_v8  ;;  %v306_v13 = vsel %vm300_vm1, %v270_v7, 0.0  ;;  %v272_v14 = vld [vmem:[%s1431_s14 + $0x28] sm:$0xff]  ;;  %v308_v16 = vsel %vm300_vm1, %v271_v11, 0.0  ;;  %v273_v17 = vld [vmem:[%s1431_s14 + $0x30] sm:$0xff]  ;;  %v274_v20 = vld [vmem:[%s1431_s14 + $0x38] sm:$0xff]  ;;  %v376_v27 = vmul.f32 %v269_v6, %v269_v6  ;;  %s252_s1 = scalar_lea.vmem [#allocation9], %s1427_s13 }
  0x2d   : > { %1089 = vset.pattern.permute.xlu0 %v1443_v2  ;;  %v1448_v3 = vadd.s32 8, %v1443_v2  ;;  %v310_v19 = vsel %vm300_vm1, %v272_v14, 0.0  ;;  %v312_v22 = vsel %vm300_vm1, %v273_v17, 0.0  ;;  %v275_v24 = vld [vmem:[%s1431_s14 + $0x40] sm:$0xff]  ;;  %v314_v28 = vsel %vm300_vm1, %v274_v20, 0.0  ;;  %v276_v29 = vld [vmem:[%s1431_s14 + $0x48] sm:$0xff] }
  0x2e   : > { %v305_v15 = vadd.f32 %v304_v10, %v303_v12  ;;  %v377_v31 = vmul.f32 %v270_v7, %v270_v7  ;;  %v316_v32 = vsel %vm300_vm1, %v275_v24, 0.0  ;;  %v406_v33 = vsel %vm300_vm1, %v374_v23, 0.0  ;;  %v277_v34 = vld [vmem:[%s1431_s14 + $0x50] sm:$0xff]  ;;  %v278_v41 = vld [vmem:[%s1431_s14 + $0x58] sm:$0xff]  ;;  %v279_v47 = vld [vmem:[%s1431_s14 + $0x60] sm:$0xff]  ;;  %s862_s6 = sshll.u32 %s252_s1, 4  ;;  %s863_s6 = int_to_ptr.vmem [resolvable:$true] %s862_s6 }
  0x2f   : > { %1090 = vset.pattern.permute.xlu1 %v1448_v3  ;;  %v378_v36 = vmul.f32 %v271_v11, %v271_v11  ;;  %v407_v37 = vsel %vm300_vm1, %v375_v26, 0.0  ;;  %v409_v38 = vsel %vm300_vm1, %v376_v27, 0.0  ;;  %v318_v39 = vsel %vm300_vm1, %v276_v29, 0.0  ;;  %v280_v53 = vld [vmem:[%s1431_s14 + $0x68] sm:$0xff]  ;;  %v281_v59 = vld [vmem:[%s1431_s14 + $0x70] sm:$0xff]  ;;  %v282_v4 = vld [vmem:[%s1431_s14 + $0x78] sm:$0xff] }
  0x30   : > { %v307_v18 = vadd.f32 %v306_v13, %v305_v15  ;;  %v408_v40 = vadd.f32 %v407_v37, %v406_v33  ;;  %v379_v43 = vmul.f32 %v272_v14, %v272_v14  ;;  %v411_v44 = vsel %vm300_vm1, %v377_v31, 0.0  ;;  %v283_v10 = vld [vmem:[%s1431_s14 + $0x80] sm:$0xff]  ;;  %s864_s9 = sshll.u32 %s860_s26, 4  ;;  %s848_s11 = scalar_lea.sflag [#allocation6], %s1427_s13  ;;  %s865_s9 = int_to_ptr.hbm [resolvable:$true] %s864_s9 }
  0x31   : > { %v320_v45 = vsel %vm300_vm1, %v277_v34, 0.0  ;;  %v380_v49 = vmul.f32 %v273_v17, %v273_v17  ;;  %v413_v50 = vsel %vm300_vm1, %v378_v36, 0.0  ;;  %v322_v51 = vsel %vm300_vm1, %v278_v41, 0.0  ;;  %s1189_s21 = sshra.s32 %s865_s9, 4  ;;  %s1195_s30 = scalar_lea.hbm %s1685_s3, 2  ;;  %s1190_s21 = int_to_ptr.hbm [resolvable:$true] %s1189_s21 }
  0x32   : > { %v309_v21 = vadd.f32 %v308_v16, %v307_v18  ;;  %v410_v46 = vadd.f32 %v409_v38, %v408_v40  ;;  %v381_v55 = vmul.f32 %v274_v20, %v274_v20  ;;  %v415_v56 = vsel %vm300_vm1, %v379_v43, 0.0  ;;  %v284_v16 = vld [vmem:[%s1431_s14 + $0x88] sm:$0xff]  ;;  %s1191_s22 = scalar_lea.hbm %s1190_s21, 1  ;;  %p1196_p11 = scmp.lt.s32.totalorder %s1190_s21, %s1685_s3 }
  0x33   : > { %v324_v57 = vsel %vm300_vm1, %v279_v47, 0.0  ;;  %v382_v61 = vmul.f32 %v275_v24, %v275_v24  ;;  %v417_v62 = vsel %vm300_vm1, %v380_v49, 0.0  ;;  %v326_v63 = vsel %vm300_vm1, %v280_v53, 0.0  ;;  %v288_v40 = vld [vmem:[%s1431_s14 + $0xa8] sm:$0xff]  ;;  %p1192_p3 = scmp.ne.s32.totalorder %s1190_s21, %s1191_s22  ;;  %p1197_p12 = scmp.lt.s32.totalorder %s1195_s30, %s1191_s22 }
  0x34   : > { %v311_v25 = vadd.f32 %v310_v19, %v309_v21  ;;  %v412_v52 = vadd.f32 %v411_v44, %v410_v46  ;;  %v383_v6 = vmul.f32 %v276_v29, %v276_v29  ;;  %v419_v7 = vsel %vm300_vm1, %v381_v55, 0.0  ;;  %v289_v46 = vld [vmem:[%s1431_s14 + $0xb0] sm:$0xff] }
  0x35   : > { %v328_v8 = vsel %vm300_vm1, %v281_v59, 0.0  ;;  %v384_v12 = vmul.f32 %v277_v34, %v277_v34  ;;  %v421_v13 = vsel %vm300_vm1, %v382_v61, 0.0  ;;  %v330_v14 = vsel %vm300_vm1, %v282_v4, 0.0  ;;  %v287_v34 = vld [vmem:[%s1431_s14 + $0xa0] sm:$0xff]  ;;  %p1193_p5 = pnand %p1192_p3, %p1378_p8  ;;  %p1198_p0 = por %p1197_p12, %p1196_p11 }
  0x36   : > { %v313_v30 = vadd.f32 %v312_v22, %v311_v25  ;;  %v414_v58 = vadd.f32 %v413_v50, %v412_v52  ;;  %v385_v18 = vmul.f32 %v278_v41, %v278_v41  ;;  %v423_v19 = vsel %vm300_vm1, %v383_v6, 0.0  ;;  %v285_v22 = vld [vmem:[%s1431_s14 + $0x90] sm:$0xff]  ;;  %v290_v52 = vld [vmem:[%s1431_s14 + $0xb8] sm:$0xff] }
  0x37   : > { %v332_v20 = vsel %vm300_vm1, %v283_v10, 0.0  ;;  %v386_v24 = vmul.f32 %v279_v47, %v279_v47  ;;  %v425_v25 = vsel %vm300_vm1, %v384_v12, 0.0  ;;  %v334_v26 = vsel %vm300_vm1, %v284_v16, 0.0  ;;  %p1194_p7 = pneg %p1193_p5 }
  0x38   : > { %v315_v35 = vadd.f32 %v314_v28, %v313_v30  ;;  %v416_v1 = vadd.f32 %v415_v56, %v414_v58  ;;  %v286_v28 = vld [vmem:[%s1431_s14 + $0x98] sm:$0xff]  ;;  %v387_v30 = vmul.f32 %v280_v53, %v280_v53  ;;  %v427_v31 = vsel %vm300_vm1, %v385_v18, 0.0  ;;  %v291_v58 = vld [vmem:[%s1431_s14 + $0xc0] sm:$0xff] }
  0x39   : > { %v388_v36 = vmul.f32 %v281_v59, %v281_v59  ;;  %v429_v37 = vsel %vm300_vm1, %v386_v24, 0.0  ;;  %v338_v38 = vsel %vm300_vm1, %v286_v28, 0.0  ;;  %v340_v44 = vsel %vm300_vm1, %v287_v34, 0.0  ;;  %p1199_p1 = pnand %p1198_p0, %p1194_p7 }
  0x3a   : > { %v317_v42 = vadd.f32 %v316_v32, %v315_v35  ;;  %v418_v9 = vadd.f32 %v417_v62, %v416_v1  ;;  %v336_v32 = vsel %vm300_vm1, %v285_v22, 0.0  ;;  %v431_v43 = vsel %vm300_vm1, %v387_v30, 0.0  ;;  %v292_v1 = vld [vmem:[%s1431_s14 + $0xc8] sm:$0xff] }
  0x3b   : > { %v433_v49 = vsel %vm300_vm1, %v388_v36, 0.0  ;;  %v342_v50 = vsel %vm300_vm1, %v288_v40, 0.0  ;;  %v344_v56 = vsel %vm300_vm1, %v289_v46, 0.0  ;;  %v346_v62 = vsel %vm300_vm1, %v290_v52, 0.0 }
  0x3c   : > { %v319_v48 = vadd.f32 %v318_v39, %v317_v42  ;;  %v420_v15 = vadd.f32 %v419_v7, %v418_v9  ;;  %v389_v42 = vmul.f32 %v282_v4, %v282_v4  ;;  %v348_v7 = vsel %vm300_vm1, %v291_v58, 0.0  ;;  %v293_v9 = vld [vmem:[%s1431_s14 + $0xd0] sm:$0xff] }
  0x3d   : > { %vm703_vm15 = vcmask 130112  }
  0x3e   : > { %v321_v54 = vadd.f32 %v320_v45, %v319_v48  ;;  %v422_v21 = vadd.f32 %v421_v13, %v420_v15  ;;  %v390_v48 = vmul.f32 %v283_v10, %v283_v10  ;;  %v435_v55 = vsel %vm300_vm1, %v389_v42, 0.0  ;;  %v294_v15 = vld [vmem:[%s1431_s14 + $0xd8] sm:$0xff] }
  0x3f   : > { %v350_v13 = vsel %vm300_vm1, %v292_v1, 0.0 }
  0x40   : > { %v323_v60 = vadd.f32 %v322_v51, %v321_v54  ;;  %v424_v27 = vadd.f32 %v423_v19, %v422_v21  ;;  %v391_v54 = vmul.f32 %v284_v16, %v284_v16  ;;  %v437_v61 = vsel %vm300_vm1, %v390_v48, 0.0  ;;  %v295_v21 = vld [vmem:[%s1431_s14 + $0xe0] sm:$0xff] }
  0x41   : > { %v352_v19 = vsel %vm300_vm1, %v293_v9, 0.0 }
  0x42   : > { %v325_v5 = vadd.f32 %v324_v57, %v323_v60  ;;  %v426_v33 = vadd.f32 %v425_v25, %v424_v27  ;;  %v392_v60 = vmul.f32 %v285_v22, %v285_v22  ;;  %v439_v6 = vsel %vm300_vm1, %v391_v54, 0.0  ;;  %v296_v27 = vld [vmem:[%s1431_s14 + $0xe8] sm:$0xff] }
  0x43   : > { %v354_v25 = vsel %vm300_vm1, %v294_v15, 0.0 }
  0x44   : > { %v327_v11 = vadd.f32 %v326_v63, %v325_v5  ;;  %v428_v39 = vadd.f32 %v427_v31, %v426_v33  ;;  %v393_v5 = vmul.f32 %v286_v28, %v286_v28  ;;  %v441_v12 = vsel %vm300_vm1, %v392_v60, 0.0  ;;  %v297_v33 = vld [vmem:[%s1431_s14 + $0xf0] sm:$0xff] }
  0x45   : > { %v356_v31 = vsel %vm300_vm1, %v295_v21, 0.0 }
  0x46   : > { %v329_v17 = vadd.f32 %v328_v8, %v327_v11  ;;  %v430_v45 = vadd.f32 %v429_v37, %v428_v39  ;;  %v394_v11 = vmul.f32 %v287_v34, %v287_v34  ;;  %v443_v18 = vsel %vm300_vm1, %v393_v5, 0.0  ;;  %v298_v39 = vld [vmem:[%s1431_s14 + $0xf8] sm:$0xff] }
  0x47   : > { %v358_v37 = vsel %vm300_vm1, %v296_v27, 0.0  ;;  %v362_v48 = vsel %vm300_vm1, %v298_v39, 0.0  ;;  %v1545_v5 = vadd.s32 16, %v1443_v2 }
  0x48   : > { %v331_v23 = vadd.f32 %v330_v14, %v329_v17  ;;  %v432_v51 = vadd.f32 %v431_v43, %v430_v45  ;;  %v395_v17 = vmul.f32 %v288_v40, %v288_v40  ;;  %v445_v24 = vsel %vm300_vm1, %v394_v11, 0.0 }
  0x49   : > { %v360_v43 = vsel %vm300_vm1, %v297_v33, 0.0  ;;  %1091 = vset.pattern.permute.xlu2 %v1545_v5 }
  0x4a   : > { %v333_v29 = vadd.f32 %v332_v20, %v331_v23  ;;  %v434_v57 = vadd.f32 %v433_v49, %v432_v51  ;;  %v396_v23 = vmul.f32 %v289_v46, %v289_v46  ;;  %v447_v30 = vsel %vm300_vm1, %v395_v17, 0.0 }
  0x4b   : > { %v400_v46 = vmul.f32 %v293_v9, %v293_v9  ;;  %v401_v51 = vmul.f32 %v294_v15, %v294_v15  ;;  %v299_v15 = vld [vmem:[#allocation2] sm:$0x1] }
  0x4c   : > { %v335_v35 = vadd.f32 %v334_v26, %v333_v29  ;;  %v436_v63 = vadd.f32 %v435_v55, %v434_v57  ;;  %v397_v29 = vmul.f32 %v290_v52, %v290_v52  ;;  %v449_v36 = vsel %vm300_vm1, %v396_v23, 0.0 }
  0x4d   : > { %v402_v55 = vmul.f32 %v295_v21, %v295_v21  ;;  %v459_v60 = vsel %vm300_vm1, %v401_v51, 0.0 }
  0x4e   : > { %v337_v41 = vadd.f32 %v336_v32, %v335_v35  ;;  %v438_v8 = vadd.f32 %v437_v61, %v436_v63  ;;  %v398_v35 = vmul.f32 %v291_v58, %v291_v58  ;;  %v451_v42 = vsel %vm300_vm1, %v397_v29, 0.0 }
  0x4f   : > { %v404_v63 = vmul.f32 %v297_v33, %v297_v33 }
  0x50   : > { %v339_v47 = vadd.f32 %v338_v38, %v337_v41  ;;  %v440_v14 = vadd.f32 %v439_v6, %v438_v8  ;;  %v399_v41 = vmul.f32 %v292_v1, %v292_v1  ;;  %v461_v1 = vsel %vm300_vm1, %v402_v55, 0.0 }
  0x51   : > { %v465_v11 = vsel %vm300_vm1, %v404_v63, 0.0 }
  0x52   : > { %v341_v53 = vadd.f32 %v340_v44, %v339_v47  ;;  %v442_v20 = vadd.f32 %v441_v12, %v440_v14  ;;  %v453_v47 = vsel %vm300_vm1, %v398_v35, 0.0  ;;  %v455_v52 = vsel %vm300_vm1, %v399_v41, 0.0 }
  0x54   : > { %v343_v59 = vadd.f32 %v342_v50, %v341_v53  ;;  %v444_v26 = vadd.f32 %v443_v18, %v442_v20 }
  0x56   : > { %v345_v4 = vadd.f32 %v344_v56, %v343_v59  ;;  %v446_v32 = vadd.f32 %v445_v24, %v444_v26  ;;  %v457_v56 = vsel %vm300_vm1, %v400_v46, 0.0  ;;  %v403_v59 = vmul.f32 %v296_v27, %v296_v27  ;;  %v373_v26 = vld [vmem:[#allocation3] sm:$0x1] }
  0x58   : > { %v347_v10 = vadd.f32 %v346_v62, %v345_v4  ;;  %v448_v38 = vadd.f32 %v447_v30, %v446_v32  ;;  %v463_v8 = vsel %vm300_vm1, %v403_v59, 0.0  ;;  %v1554_v30 = vadd.s32 24, %v1443_v2 }
  0x5a   : > { %v349_v16 = vadd.f32 %v348_v7, %v347_v10  ;;  %v450_v44 = vadd.f32 %v449_v36, %v448_v38  ;;  %v405_v7 = vmul.f32 %v298_v39, %v298_v39 }
  0x5c   : > { %v351_v22 = vadd.f32 %v350_v13, %v349_v16  ;;  %v452_v49 = vadd.f32 %v451_v42, %v450_v44  ;;  %v467_v14 = vsel %vm300_vm1, %v405_v7, 0.0  ;;  %vm707_vm1 = vcmask 195712  }
  0x5e   : > { %v353_v28 = vadd.f32 %v352_v19, %v351_v22  ;;  %v454_v53 = vadd.f32 %v453_v47, %v452_v49 }
  0x60   : > { %v355_v34 = vadd.f32 %v354_v25, %v353_v28  ;;  %v456_v57 = vadd.f32 %v455_v52, %v454_v53 }
  0x62   : > { %v357_v40 = vadd.f32 %v356_v31, %v355_v34  ;;  %v458_v61 = vadd.f32 %v457_v56, %v456_v57  ;;  %v1299_v31 = vmov 256.0  }
  0x63   : > { %1105 = vrcp.f32 %v1299_v31  ;;  %v1300_v31 = vmov 0  }
  0x64   : > { %v359_v45 = vadd.f32 %v358_v37, %v357_v40  ;;  %v460_v4 = vadd.f32 %v459_v60, %v458_v61 }
  0x66   : > { %v361_v50 = vadd.f32 %v360_v43, %v359_v45  ;;  %v462_v9 = vadd.f32 %v461_v1, %v460_v4 }
  0x68   : > { %v363_v54 = vadd.f32 %v362_v48, %v361_v50  ;;  %v464_v12 = vadd.f32 %v463_v8, %v462_v9 }
  0x69   : > { %v1106_v32 = vpop.eup %1105 }
  0x6a   : > { %v364_v58 = vrot.slane %v363_v54, 4  ;;  %v466_v16 = vadd.f32 %v465_v11, %v464_v12  ;;  %v537_v33 = vmul.f32 256.0, %v1106_v32  ;;  %vm541_vm2 = vweird.f32 %v1106_v32 }
  0x6c   : > { %v365_v62 = vadd.f32 %v364_v58, %v363_v54  ;;  %v468_v18 = vadd.f32 %v467_v14, %v466_v16  ;;  %v538_v34 = vsub.f32 1.0, %v537_v33 }
  0x6e   : > { %v366_v6 = vrot.slane %v365_v62, 2  ;;  %v469_v20 = vrot.slane %v468_v18, 4  ;;  %v539_v35 = vmul.f32 %v1106_v32, %v538_v34 }
  0x70   : > { %v367_v10 = vadd.f32 %v366_v6, %v365_v62  ;;  %v470_v21 = vadd.f32 %v469_v20, %v468_v18  ;;  %v540_v36 = vadd.f32 %v1106_v32, %v539_v35 }
  0x72   : > { %v368_v13 = vrot.slane %v367_v10, 1  ;;  %v471_v22 = vrot.slane %v470_v21, 2  ;;  %v542_v39 = vsel %vm541_vm2, %v1106_v32, %v540_v36  ;;  %vm711_vm2 = vcmask 261312  }
  0x74   : > { %v369_v17 = vadd.f32 %v368_v13, %v367_v10  ;;  %v472_v23 = vadd.f32 %v471_v22, %v470_v21 }
  0x76   : > { %v370_v19 = vadd.f32 %v369_v17, %v299_v15  ;;  %v473_v25 = vrot.slane %v472_v23, 1 }
  0x78   : > { %372 = vst.msk [vmem:[#allocation2] sm:$0x1] %vm264_vm0, %v370_v19  ;;  %v474_v27 = vadd.f32 %v473_v25, %v472_v23 }
  0x7a   : > { %v475_v28 = vadd.f32 %v474_v27, %v373_v26 }
  0x7c   : > { %476 = vst.msk [vmem:[#allocation3] sm:$0x1] %vm264_vm0, %v475_v28 }
  0x7f   : > { %v1103_v24 = vld [vmem:[#allocation2] ss:$0 sm:$0xff] }
  0x80   : > { %496 = vperm.xlu1 %1090, %v1103_v24   ;;  %490 = vperm.xlu0 %1089, %v1103_v24  }
  0x81   : > { %502 = vperm.xlu2 %1091, %v1103_v24  }
  0x83   : > { %v1104_v29 = vld [vmem:[#allocation3] ss:$0 sm:$0xff] }
  0x88   : > { %522 = vperm.xlu1 %1090, %v1104_v29   ;;  %516 = vperm.xlu0 %1089, %v1104_v29  }
  0x89   : > { %528 = vperm.xlu2 %1091, %v1104_v29  }
  0x90   : > { %1092 = vset.pattern.permute.xlu0 %v1554_v30  ;;  %1093 = vset.pattern.permute.xlu1 %v1554_v30 }
  0x91   : > { %1094 = vset.pattern.permute.xlu2 %v1300_v31 }
  0x98   : > { %508 = vperm.xlu0 %1092, %v1103_v24   ;;  %534 = vperm.xlu1 %1093, %v1104_v29  }
  0xa0   : > { %1095 = vset.pattern.permute.xlu1 %v1300_v31  ;;  %1096 = vset.pattern.permute.xlu0 %v1300_v31 }
  0xdb   : > { %v503_v42 = vpop.permute.xlu2 %502 }
  0xdc   : > { %v1566_v54 = vmul.f32 %v542_v39, %v503_v42 }
  0xde   : > { %v553_v57 = vmul.f32 %v1566_v54, %v1566_v54 }
  0xe3   : > { %v529_v55 = vpop.permute.xlu2 %528 }
  0xe4   : > { %v549_v58 = vmul.f32 %v542_v39, %v529_v55 }
  0xe6   : > { %v557_v60 = vsub.f32 %v549_v58, %v553_v57 }
  0xe8   : > { %v561_v1 = vmax.f32 %v557_v60, 0.0 }
  0xea   : > { %v1572_v10 = vadd.f32 1e-05, %v561_v1 }
  0xec   : > { %vm593_vm9 = vweird.f32 %v1572_v10 }
  0xf2   : > { %v497_v37 = vpop.permute.xlu1 %496  ;;  %v491_v38 = vpop.permute.xlu0 %490 }
  0xf3   : > { %v1558_v40 = vmul.f32 %v542_v39, %v497_v37  ;;  %v1560_v41 = vmul.f32 %v542_v39, %v491_v38 }
  0xf5   : > { %v552_v43 = vmul.f32 %v1558_v40, %v1558_v40  ;;  %v551_v46 = vmul.f32 %v1560_v41, %v1560_v41 }
  0xfa   : > { %v523_v44 = vpop.permute.xlu1 %522  ;;  %v517_v45 = vpop.permute.xlu0 %516 }
  0xfb   : > { %v548_v47 = vmul.f32 %v542_v39, %v523_v44  ;;  %v547_v48 = vmul.f32 %v542_v39, %v517_v45 }
  0xfd   : > { %v556_v49 = vsub.f32 %v548_v47, %v552_v43  ;;  %v555_v50 = vsub.f32 %v547_v48, %v551_v46 }
  0xff   : > { %v560_v51 = vmax.f32 %v556_v49, 0.0  ;;  %v559_v52 = vmax.f32 %v555_v50, 0.0 }
 0x101   : > { %v563_v53 = vadd.f32 1e-05, %v559_v52  ;;  %v564_v56 = vadd.f32 1e-05, %v560_v51 }
 0x103   : > { %1107 = vrsqrt.f32 %v563_v53  ;;  %vm573_vm4 = vweird.f32 %v563_v53  ;;  %vm583_vm7 = vweird.f32 %v564_v56 }
 0x104   : > { %1109 = vrsqrt.f32 %v564_v56 }
 0x105   : > { %1111 = vrsqrt.f32 %v1572_v10 }
 0x109   : > { %v1108_v59 = vpop.eup %1107 }
 0x10a   : > { %v568_v61 = vmul.f32 %v1108_v59, %v563_v53  ;;  %v1110_v62 = vpop.eup %1109  ;;  %v509_v4 = vpop.permute.xlu0 %508  ;;  %vm574_vm3 = vweird.f32 %v1108_v59 }
 0x10b   : > { %v578_v7 = vmul.f32 %v1110_v62, %v564_v56  ;;  %v1570_v9 = vmul.f32 %v542_v39, %v509_v4  ;;  %v535_v11 = vpop.permute.xlu1 %534  ;;  %vm575_vm5 = vmor %vm573_vm4, %vm574_vm3  ;;  %v1112_v25 = vpop.eup %1111  ;;  %vm584_vm6 = vweird.f32 %v1110_v62 }
 0x10c   : > { %v569_v63 = vmul.f32 %v1108_v59, %v568_v61  ;;  %v550_v15 = vmul.f32 %v542_v39, %v535_v11  ;;  %v588_v32 = vmul.f32 %v1112_v25, %v1572_v10  ;;  %vm585_vm8 = vmor %vm583_vm7, %vm584_vm6  ;;  %vm594_vm10 = vweird.f32 %v1112_v25 }
 0x10d   : > { %v579_v13 = vmul.f32 %v1110_v62, %v578_v7  ;;  %v554_v14 = vmul.f32 %v1570_v9, %v1570_v9  ;;  %vm595_vm11 = vmor %vm593_vm9, %vm594_vm10 }
 0x10e   : > { %v570_v6 = vmul.f32 0.5, %v569_v63  ;;  %v589_v35 = vmul.f32 %v1112_v25, %v588_v32 }
 0x10f   : > { %v580_v17 = vmul.f32 0.5, %v579_v13  ;;  %v558_v22 = vsub.f32 %v550_v15, %v554_v14 }
 0x110   : > { %v571_v8 = vsub.f32 1.5, %v570_v6  ;;  %v590_v37 = vmul.f32 0.5, %v589_v35 }
 0x111   : > { %v581_v26 = vsub.f32 1.5, %v580_v17  ;;  %v562_v29 = vmax.f32 %v558_v22, 0.0 }
 0x112   : > { %v572_v12 = vmul.f32 %v1108_v59, %v571_v8  ;;  %v591_v46 = vsub.f32 1.5, %v590_v37 }
 0x113   : > { %v582_v33 = vmul.f32 %v1110_v62, %v581_v26  ;;  %v566_v34 = vadd.f32 1e-05, %v562_v29  ;;  %v482_v29 = vld [vmem:[#allocation7] sm:$0x1] }
 0x114   : > { %v576_v16 = vsel %vm575_vm5, %v1108_v59, %v572_v12  ;;  %v592_v52 = vmul.f32 %v1112_v25, %v591_v46 }
 0x115   : > { %v611_v18 = vperm.slane %v576_v16, 0  ;;  %v612_v19 = vperm.slane %v576_v16, 1  ;;  %v613_v20 = vperm.slane %v576_v16, 2  ;;  %v614_v21 = vperm.slane %v576_v16, 3 }
 0x116   : > { %v615_v23 = vperm.slane %v576_v16, 4  ;;  %v616_v24 = vperm.slane %v576_v16, 5  ;;  %v617_v27 = vperm.slane %v576_v16, 6  ;;  %v618_v28 = vperm.slane %v576_v16, 7 }
 0x117   : > { %643 = vst [vmem:[#allocation1] ss:$9 sm:$0xff] %v611_v18  ;;  %v586_v36 = vsel %vm585_vm8, %v1110_v62, %v582_v33  ;;  %1113 = vrsqrt.f32 %v566_v34  ;;  %v596_v55 = vsel %vm595_vm11, %v1112_v25, %v592_v52  ;;  %vm603_vm12 = vweird.f32 %v566_v34 }
 0x118   : > { %645 = vst [vmem:[#allocation1 + $0x1] ss:$9 sm:$0xff] %v612_v19  ;;  %v619_v38 = vperm.slane %v586_v36, 0  ;;  %v620_v39 = vperm.slane %v586_v36, 1  ;;  %v621_v43 = vperm.slane %v586_v36, 2  ;;  %v622_v44 = vperm.slane %v586_v36, 3 }
 0x119   : > { %647 = vst [vmem:[#allocation1 + $0x2] ss:$9 sm:$0xff] %v613_v20  ;;  %v623_v47 = vperm.slane %v586_v36, 4  ;;  %v624_v48 = vperm.slane %v586_v36, 5  ;;  %v625_v49 = vperm.slane %v586_v36, 6  ;;  %v626_v50 = vperm.slane %v586_v36, 7 }
 0x11a   : > { %649 = vst [vmem:[#allocation1 + $0x3] ss:$9 sm:$0xff] %v614_v21  ;;  %v627_v56 = vperm.slane %v596_v55, 0  ;;  %v628_v58 = vperm.slane %v596_v55, 1  ;;  %v629_v60 = vperm.slane %v596_v55, 2  ;;  %v630_v61 = vperm.slane %v596_v55, 3 }
 0x11b   : > { %651 = vst [vmem:[#allocation1 + $0x4] ss:$9 sm:$0xff] %v615_v23  ;;  %v631_v62 = vperm.slane %v596_v55, 4  ;;  %v632_v1 = vperm.slane %v596_v55, 5  ;;  %v633_v4 = vperm.slane %v596_v55, 6  ;;  %v634_v6 = vperm.slane %v596_v55, 7 }
 0x11c   : > { %653 = vst [vmem:[#allocation1 + $0x5] ss:$9 sm:$0xff] %v616_v24  ;;  %v1585_v19 = vand.u32 127, %v486_v0 }
 0x11d   : > { %655 = vst [vmem:[#allocation1 + $0x6] ss:$9 sm:$0xff] %v617_v27  ;;  %v1114_v45 = vpop.eup %1113 }
 0x11e   : > { %657 = vst [vmem:[#allocation1 + $0x7] ss:$9 sm:$0xff] %v618_v28  ;;  %v598_v51 = vmul.f32 %v1114_v45, %v566_v34  ;;  %vm604_vm13 = vweird.f32 %v1114_v45  ;;  %v1588_v21 = vadd.s32 4294967288, %v1585_v19  ;;  %v1592_v24 = vadd.s32 4294967280, %v1585_v19 }
 0x11f   : > { %vm605_vm14 = vmor %vm603_vm12, %vm604_vm13  ;;  %v1596_v26 = vadd.s32 4294967272, %v1585_v19 }
 0x120   : > { %v599_v53 = vmul.f32 %v1114_v45, %v598_v51 }
 0x122   : > { %v600_v57 = vmul.f32 0.5, %v599_v53 }
 0x124   : > { %v601_v63 = vsub.f32 1.5, %v600_v57 }
 0x125   : > { %v658_v42 = vld [vmem:[#allocation1] sm:$0xff] }
 0x126   : > { %659 = vst [vmem:[#allocation1] ss:$9 sm:$0xff] %v619_v38  ;;  %687 = vperm.xlu2 %1094, %v658_v42   ;;  %v602_v7 = vmul.f32 %v1114_v45, %v601_v63 }
 0x127   : > { %660 = vst [vmem:[#allocation1 + $0x1] ss:$9 sm:$0xff] %v620_v39 }
 0x128   : > { %661 = vst [vmem:[#allocation1 + $0x2] ss:$9 sm:$0xff] %v621_v43  ;;  %v606_v8 = vsel %vm605_vm14, %v1114_v45, %v602_v7 }
 0x129   : > { %662 = vst [vmem:[#allocation1 + $0x3] ss:$9 sm:$0xff] %v622_v44  ;;  %v635_v10 = vperm.slane %v606_v8, 0  ;;  %v636_v12 = vperm.slane %v606_v8, 1  ;;  %v637_v13 = vperm.slane %v606_v8, 2  ;;  %v638_v14 = vperm.slane %v606_v8, 3 }
 0x12a   : > { %663 = vst [vmem:[#allocation1 + $0x4] ss:$9 sm:$0xff] %v623_v47  ;;  %v639_v15 = vperm.slane %v606_v8, 4  ;;  %v640_v16 = vperm.slane %v606_v8, 5  ;;  %v641_v17 = vperm.slane %v606_v8, 6  ;;  %v642_v18 = vperm.slane %v606_v8, 7 }
 0x12b   : > { %664 = vst [vmem:[#allocation1 + $0x5] ss:$9 sm:$0xff] %v624_v48 }
 0x12c   : > { %665 = vst [vmem:[#allocation1 + $0x6] ss:$9 sm:$0xff] %v625_v49 }
 0x12d   : > { %666 = vst [vmem:[#allocation1 + $0x7] ss:$9 sm:$0xff] %v626_v50 }
 0x134   : > { %v667_v59 = vld [vmem:[#allocation1] sm:$0xff] }
 0x135   : > { %668 = vst [vmem:[#allocation1] ss:$9 sm:$0xff] %v627_v56  ;;  %690 = vperm.xlu1 %1095, %v667_v59  }
 0x136   : > { %669 = vst [vmem:[#allocation1 + $0x1] ss:$9 sm:$0xff] %v628_v58 }
 0x137   : > { %670 = vst [vmem:[#allocation1 + $0x2] ss:$9 sm:$0xff] %v629_v60 }
 0x138   : > { %671 = vst [vmem:[#allocation1 + $0x3] ss:$9 sm:$0xff] %v630_v61 }
 0x139   : > { %672 = vst [vmem:[#allocation1 + $0x4] ss:$9 sm:$0xff] %v631_v62 }
 0x13a   : > { %673 = vst [vmem:[#allocation1 + $0x5] ss:$9 sm:$0xff] %v632_v1 }
 0x13b   : > { %674 = vst [vmem:[#allocation1 + $0x6] ss:$9 sm:$0xff] %v633_v4 }
 0x13c   : > { %675 = vst [vmem:[#allocation1 + $0x7] ss:$9 sm:$0xff] %v634_v6 }
 0x13d   : > { %1097 = vset.pattern.permute.xlu1 %v1443_v2 }
 0x143   : > { %v676_v11 = vld [vmem:[#allocation1] sm:$0xff] }
 0x144   : > { %677 = vst [vmem:[#allocation1] ss:$9 sm:$0xff] %v635_v10  ;;  %693 = vperm.xlu2 %1094, %v676_v11  }
 0x145   : > { %678 = vst [vmem:[#allocation1 + $0x1] ss:$9 sm:$0xff] %v636_v12 }
 0x146   : > { %679 = vst [vmem:[#allocation1 + $0x2] ss:$9 sm:$0xff] %v637_v13 }
 0x147   : > { %680 = vst [vmem:[#allocation1 + $0x3] ss:$9 sm:$0xff] %v638_v14 }
 0x148   : > { %681 = vst [vmem:[#allocation1 + $0x4] ss:$9 sm:$0xff] %v639_v15 }
 0x149   : > { %682 = vst [vmem:[#allocation1 + $0x5] ss:$9 sm:$0xff] %v640_v16 }
 0x14a   : > { %683 = vst [vmem:[#allocation1 + $0x6] ss:$9 sm:$0xff] %v641_v17 }
 0x14b   : > { %684 = vst [vmem:[#allocation1 + $0x7] ss:$9 sm:$0xff] %v642_v18 }
 0x14c   : > { %1098 = vset.pattern.permute.xlu2 %v1448_v3 }
 0x152   : > { %v685_v2 = vld [vmem:[#allocation1] sm:$0xff] }
 0x153   : > { %696 = vperm.xlu0 %1096, %v685_v2  }
 0x180   : > { %v688_v20 = vpop.permute.xlu2 %687 }
 0x181   : > { %v700_v3 = vperm.slane %v688_v20, %v1585_v19 }
 0x19e   : > { %v694_v25 = vpop.permute.xlu2 %693 }
 0x19f   : > { %v706_v27 = vperm.slane %v694_v25, %v1592_v24 }
 0x1a7   : > { %v691_v22 = vpop.permute.xlu1 %690 }
 0x1a8   : > { %v702_v23 = vperm.slane %v691_v22, %v1588_v21 }
 0x1aa   : > { %v704_v0 = vsel %vm703_vm15, %v702_v23, %v700_v3 }
 0x1ab   : > { %v708_v33 = vsel %vm707_vm1, %v706_v27, %v704_v0 }
 0x1c5   : > { %v697_v28 = vpop.permute.xlu0 %696 }
 0x1c6   : > { %v710_v32 = vperm.slane %v697_v28, %v1596_v26 }
 0x1c8   : > { %v712_v34 = vsel %vm711_vm2, %v710_v32, %v708_v33 }
 0x1c9   : > { %v714_v35 = vmul.f32 %v712_v34, %v482_v29 }
 0x1cb   : > { %v716_v36 = vperm.slane %v714_v35, 0  ;;  %845 = vst.msk [vmem:[%s252_s1] sm:$0x1] %vm264_vm0, %v714_v35 }
 0x1cd   : > { %727 = vperm.xlu2 %1098, %v716_v36   ;;  %721 = vperm.xlu1 %1097, %v716_v36  }
 0x1d5   : > { %1100 = vset.pattern.permute.xlu2 %v1554_v30  ;;  %1099 = vset.pattern.permute.xlu1 %v1545_v5 }
 0x1dd   : > { %739 = vperm.xlu2 %1100, %v716_v36   ;;  %733 = vperm.xlu1 %1099, %v716_v36  }
 0x1e5   : > { %1101 = vset.pattern.permute.xlu1 %v1300_v31  ;;  %1102 = vset.pattern.permute.xlu2 %v1300_v31 }
 0x227   : > { %v728_v5 = vpop.permute.xlu2 %727 }
 0x228   : > { %v746_v31 = vmul.f32 %v728_v5, %v1558_v40 }
 0x22a   : > { %v760_v47 = vrot.slane %v746_v31, 1  ;;  %v761_v48 = vrot.slane %v746_v31, 2  ;;  %v762_v49 = vrot.slane %v746_v31, 3  ;;  %v763_v50 = vrot.slane %v746_v31, 4 }
 0x22b   : > { %v764_v51 = vrot.slane %v746_v31, 5  ;;  %v765_v52 = vrot.slane %v746_v31, 6  ;;  %v766_v53 = vrot.slane %v746_v31, 7 }
 0x237   : > { %v740_v1 = vpop.permute.xlu2 %739 }
 0x23f   : > { %v722_v37 = vpop.permute.xlu1 %721 }
 0x240   : > { %v745_v38 = vmul.f32 %v722_v37, %v1560_v41 }
 0x242   : > { %v753_v39 = vrot.slane %v745_v38, 1  ;;  %v754_v42 = vrot.slane %v745_v38, 2  ;;  %v755_v43 = vrot.slane %v745_v38, 3  ;;  %781 = vst [vmem:[#allocation1] ss:$9 sm:$0xff] %v745_v38  ;;  %v756_v44 = vrot.slane %v745_v38, 4 }
 0x243   : > { %v757_v45 = vrot.slane %v745_v38, 5  ;;  %v758_v46 = vrot.slane %v745_v38, 6  ;;  %v759_v30 = vrot.slane %v745_v38, 7 }
 0x244   : > { %783 = vst [vmem:[#allocation1 + $0x1] ss:$9 sm:$0xff] %v753_v39 }
 0x245   : > { %785 = vst [vmem:[#allocation1 + $0x2] ss:$9 sm:$0xff] %v754_v42 }
 0x246   : > { %787 = vst [vmem:[#allocation1 + $0x3] ss:$9 sm:$0xff] %v755_v43 }
 0x247   : > { %789 = vst [vmem:[#allocation1 + $0x4] ss:$9 sm:$0xff] %v756_v44 }
 0x248   : > { %791 = vst [vmem:[#allocation1 + $0x5] ss:$9 sm:$0xff] %v757_v45 }
 0x249   : > { %793 = vst [vmem:[#allocation1 + $0x6] ss:$9 sm:$0xff] %v758_v46 }
 0x24a   : > { %795 = vst [vmem:[#allocation1 + $0x7] ss:$9 sm:$0xff] %v759_v30 }
 0x24f   : > { %v734_v55 = vpop.permute.xlu1 %733 }
 0x250   : > { %v747_v40 = vmul.f32 %v734_v55, %v1566_v54  ;;  %v748_v54 = vmul.f32 %v740_v1, %v1570_v9 }
 0x251   : > { %v796_v41 = vld [vmem:[#allocation1] sm:$0xff] }
 0x252   : > { %797 = vst [vmem:[#allocation1] ss:$9 sm:$0xff] %v746_v31  ;;  %825 = vperm.xlu0 %1096, %v796_v41   ;;  %v767_v56 = vrot.slane %v747_v40, 1  ;;  %v768_v57 = vrot.slane %v747_v40, 2  ;;  %v769_v59 = vrot.slane %v747_v40, 3  ;;  %v770_v60 = vrot.slane %v747_v40, 4 }
 0x253   : > { %798 = vst [vmem:[#allocation1 + $0x1] ss:$9 sm:$0xff] %v760_v47  ;;  %v771_v61 = vrot.slane %v747_v40, 5  ;;  %v772_v62 = vrot.slane %v747_v40, 6  ;;  %v773_v63 = vrot.slane %v747_v40, 7  ;;  %v774_v4 = vrot.slane %v748_v54, 1 }
 0x254   : > { %799 = vst [vmem:[#allocation1 + $0x2] ss:$9 sm:$0xff] %v761_v48  ;;  %v775_v7 = vrot.slane %v748_v54, 2  ;;  %v776_v8 = vrot.slane %v748_v54, 3  ;;  %v777_v10 = vrot.slane %v748_v54, 4  ;;  %v778_v11 = vrot.slane %v748_v54, 5 }
 0x255   : > { %800 = vst [vmem:[#allocation1 + $0x3] ss:$9 sm:$0xff] %v762_v49  ;;  %v779_v12 = vrot.slane %v748_v54, 6  ;;  %v780_v13 = vrot.slane %v748_v54, 7 }
 0x256   : > { %801 = vst [vmem:[#allocation1 + $0x4] ss:$9 sm:$0xff] %v763_v50 }
 0x257   : > { %802 = vst [vmem:[#allocation1 + $0x5] ss:$9 sm:$0xff] %v764_v51 }
 0x258   : > { %803 = vst [vmem:[#allocation1 + $0x6] ss:$9 sm:$0xff] %v765_v52 }
 0x259   : > { %804 = vst [vmem:[#allocation1 + $0x7] ss:$9 sm:$0xff] %v766_v53 }
 0x260   : > { %v805_v58 = vld [vmem:[#allocation1] sm:$0xff] }
 0x261   : > { %806 = vst [vmem:[#allocation1] ss:$9 sm:$0xff] %v747_v40  ;;  %828 = vperm.xlu1 %1101, %v805_v58  }
 0x262   : > { %807 = vst [vmem:[#allocation1 + $0x1] ss:$9 sm:$0xff] %v767_v56 }
 0x263   : > { %808 = vst [vmem:[#allocation1 + $0x2] ss:$9 sm:$0xff] %v768_v57 }
 0x264   : > { %809 = vst [vmem:[#allocation1 + $0x3] ss:$9 sm:$0xff] %v769_v59 }
 0x265   : > { %810 = vst [vmem:[#allocation1 + $0x4] ss:$9 sm:$0xff] %v770_v60 }
 0x266   : > { %811 = vst [vmem:[#allocation1 + $0x5] ss:$9 sm:$0xff] %v771_v61 }
 0x267   : > { %812 = vst [vmem:[#allocation1 + $0x6] ss:$9 sm:$0xff] %v772_v62 }
 0x268   : > { %813 = vst [vmem:[#allocation1 + $0x7] ss:$9 sm:$0xff] %v773_v63 }
 0x26f   : > { %v814_v6 = vld [vmem:[#allocation1] sm:$0xff] }
 0x270   : > { %831 = vperm.xlu2 %1102, %v814_v6   ;;  %815 = vst [vmem:[#allocation1] ss:$9 sm:$0xff] %v748_v54 }
 0x271   : > { %816 = vst [vmem:[#allocation1 + $0x1] ss:$9 sm:$0xff] %v774_v4 }
 0x272   : > { %817 = vst [vmem:[#allocation1 + $0x2] ss:$9 sm:$0xff] %v775_v7 }
 0x273   : > { %818 = vst [vmem:[#allocation1 + $0x3] ss:$9 sm:$0xff] %v776_v8 }
 0x274   : > { %819 = vst [vmem:[#allocation1 + $0x4] ss:$9 sm:$0xff] %v777_v10 }
 0x275   : > { %820 = vst [vmem:[#allocation1 + $0x5] ss:$9 sm:$0xff] %v778_v11 }
 0x276   : > { %821 = vst [vmem:[#allocation1 + $0x6] ss:$9 sm:$0xff] %v779_v12 }
 0x277   : > { %822 = vst [vmem:[#allocation1 + $0x7] ss:$9 sm:$0xff] %v780_v13 }
 0x278   : > { %1202 = shalt.err (!%p1199_p1)
}
 0x279   : > { %1012 = dma.vmem_to_hbm [thread:$0]  (%p1378_p8), %s863_s6, 16, %s865_s9, %s848_s11   ;;  %v483_v23 = vld [vmem:[%s1684_s2] sm:$0x1] }
 0x27a   : > { %s873_s14 = scalar_lea.hbm %s1686_s4, %s1285_s18  ;;  %s258_s24 = scalar_lea.vmem [#allocation10], %s1427_s13 }
 0x27b   : > { %s875_s26 = sshll.u32 %s258_s24, 4  ;;  %s877_s6 = sshll.u32 %s873_s14, 4  ;;  %s876_s26 = int_to_ptr.vmem [resolvable:$true] %s875_s26  ;;  %s878_s6 = int_to_ptr.hbm [resolvable:$true] %s877_s6 }
 0x27c   : > { %s852_s18 = scalar_lea.sflag [#allocation11], %s1427_s13  ;;  %s1217_s9 = sshra.s32 %s878_s6, 4  ;;  %s1218_s9 = int_to_ptr.hbm [resolvable:$true] %s1217_s9 }
 0x27d   : > { %s1219_s11 = scalar_lea.hbm %s1218_s9, 1  ;;  %s1223_s25 = scalar_lea.hbm %s1686_s4, 2 }
 0x27e   : > { %v823_v9 = vld [vmem:[#allocation1] sm:$0xff]  ;;  %p1220_p2 = scmp.ne.s32.totalorder %s1218_s9, %s1219_s11  ;;  %p1224_p10 = scmp.lt.s32.totalorder %s1218_s9, %s1686_s4 }
 0x27f   : > { %834 = vperm.xlu0 %1096, %v823_v9   ;;  %p1225_p3 = scmp.lt.s32.totalorder %s1223_s25, %s1219_s11 }
 0x280   : > { %p1221_p4 = pnand %p1220_p2, %p1378_p8 }
 0x281   : > { %p1226_p5 = por %p1225_p3, %p1224_p10 }
 0x282   : > { %p1222_p6 = pneg %p1221_p4 }
 0x284   : > { %p1227_p7 = pnand %p1226_p5, %p1222_p6 }
 0x2c4   : > { %v826_v14 = vpop.permute.xlu0 %825 }
 0x2c5   : > { %v836_v18 = vperm.slane %v826_v14, %v1585_v19 }
 0x2ca   : > { %v832_v17 = vpop.permute.xlu2 %831 }
 0x2cb   : > { %v839_v20 = vperm.slane %v832_v17, %v1592_v24 }
 0x2d3   : > { %v829_v15 = vpop.permute.xlu1 %828 }
 0x2d4   : > { %v837_v16 = vperm.slane %v829_v15, %v1588_v21 }
 0x2d6   : > { %v838_v2 = vsel %vm703_vm15, %v837_v16, %v836_v18 }
 0x2d7   : > { %v840_v19 = vsel %vm707_vm1, %v839_v20, %v838_v2 }
 0x2f1   : > { %v835_v22 = vpop.permute.xlu0 %834 }
 0x2f2   : > { %v841_v21 = vperm.slane %v835_v22, %v1596_v26 }
 0x2f4   : > { %v842_v3 = vsel %vm711_vm2, %v841_v21, %v840_v19 }
 0x2f5   : > { %v844_v25 = vsub.f32 %v483_v23, %v842_v3 }
 0x2f7   : > { %846 = vst.msk [vmem:[%s258_s24] sm:$0x1] %vm264_vm0, %v844_v25 }
 0x2f8   : > { %1230 = shalt.err (!%p1227_p7)
}
 0x2f9   : > { %1013 = dma.vmem_to_hbm [thread:$0]  (%p1378_p8), %s876_s26, 16, %s878_s6, %s852_s18  }
 0x2fa PF: > { %s1699_s13 = sld [smem:[#allocation16_spill]]  ;;  %s889_s5 = sand.u32 1, %s1273_s15  }
 0x2fb   : > { %p1025_p11 = pnand %p996_p13, %p1382_p9  ;;  %s890_s8 = scalar_lea.sflag [#allocation6], %s889_s5 }
 0x2fd   : > { %p1026_p12 = pneg %p1025_p11 }
 0x2ff   : > { %1264 = dma.done.wait (%p1026_p12), %s890_s8, 16  }
 0x300   : > { %1266 = vsyncadd (%p1026_p12), %s890_s8, 4294967280  ;;  %s899_s12 = scalar_lea.sflag [#allocation11], %s889_s5 }
 0x301   : > { %1268 = dma.done.wait (%p1026_p12), %s899_s12, 16  }
 0x302   : > { %1270 = vsyncadd (%p1026_p12), %s899_s12, 4294967280  ;;  %s25_s20 = sadd.s32 1, %s1699_s13   ;;  %s1700_s15 = smov %s1277_s16 }
 0x303   : > { %p22_p0 = scmp.ge.s32.totalorder %s25_s20, 4   ;;  %s1701_s16 = smov %s1281_s17 }
 0x304   : > { %s1702_s17 = smov %s1420_s7  ;;  %s1703_s18 = smov %s1289_s19 }
 0x305   : > { %s1704_s19 = smov %s1706_s10  ;;  %24 = sbr.rel (!%p22_p0) target bundleno = 11 (0xb), region = 120 }
 0x30a   :  { %904 = vsyncpa [#allocation5], 1 }
 0x30b   :  { %906 = vsyncpa [#allocation5 + $0x1], 1 }
 0x30c   :  { %907 = vsyncpa [#allocation8], 1 }
 0x30d   :  { %908 = vsyncpa [#allocation6], 1 }
 0x30e   :  { %910 = vsyncpa [#allocation6 + $0x1], 1 }
 0x30f   :  { %911 = vsyncpa [#allocation11], 1 }
 0x310   :  { %913 = vsyncpa [#allocation11 + $0x1], 1 }

</bundles_post_ra>
